<compile_context>
chip_gen: v6e
topology: v6e:2x2x1
jax: 0.10.0
libtpu: 0.0.40
codegen_flags: <defaults>
</compile_context>

<pallas_src>
import functools

import jax
import jax.numpy as jnp
from jax.experimental import pallas as pl
from jax.experimental.pallas import tpu as pltpu


# --------------------------------------------------------------------------
# Pallas kernel: fused encoder + reparameterize + decoder, feature-major tile.
# All activations are (features, row_tile); rows map to lanes.
# --------------------------------------------------------------------------
def _vae_kernel(training, mxu_dtype, *refs):
    if training:
        (xc_ref, eps_ref,
         w1_ref, b1_ref, w2_ref, b2_ref, wml_ref, bml_ref,
         wp1x_ref, wp1z_ref, bp1_ref, wp2_ref, bp2_ref, wam_ref, bam_ref,
         act_ref, ml_ref) = refs
    else:
        (xc_ref,
         w1_ref, b1_ref, w2_ref, b2_ref, wml_ref, bml_ref,
         wp1x_ref, wp1z_ref, bp1_ref, wp2_ref, bp2_ref, wam_ref, bam_ref,
         act_ref, ml_ref) = refs

    xc = xc_ref[...]                                   # (Sx+Sc, tile), bf16

    # ---- encode(x, c): 2-layer tanh MLP; mu/logvar heads fused ----
    h = jnp.tanh(jnp.dot(w1_ref[...], xc,
                         preferred_element_type=jnp.float32) + b1_ref[...])
    h = jnp.tanh(jnp.dot(w2_ref[...], h.astype(mxu_dtype),
                         preferred_element_type=jnp.float32) + b2_ref[...])
    ml = jnp.dot(wml_ref[...], h.astype(mxu_dtype),
                 preferred_element_type=jnp.float32) + bml_ref[...]  # (2K, t)

    K = ml.shape[0] // 2
    mu = ml[:K, :]
    logvar = ml[K:, :]

    # ---- reparameterize (training: mu + eps*exp(0.5*logvar); eval: mu) ----
    if training:
        z = mu + eps_ref[...] * jnp.exp(0.5 * logvar)
    else:
        z = mu

    # ---- decode / policy: 2-layer tanh MLP -> action_mean ----
    # wp1x is zero-embedded over the full xc feature axis, so this matmul is
    # exactly Wp1_x^T @ x[..., -P:] without any in-kernel slice/concat.
    p = jnp.tanh(jnp.dot(wp1x_ref[...], xc,
                         preferred_element_type=jnp.float32)
                 + jnp.dot(wp1z_ref[...], z.astype(mxu_dtype),
                           preferred_element_type=jnp.float32)
                 + bp1_ref[...])
    p = jnp.tanh(jnp.dot(wp2_ref[...], p.astype(mxu_dtype),
                         preferred_element_type=jnp.float32) + bp2_ref[...])
    act = jnp.dot(wam_ref[...], p.astype(mxu_dtype),
                  preferred_element_type=jnp.float32) + bam_ref[...]

    act_ref[...] = act                                  # (A, tile)  f32
    ml_ref[...] = ml                                    # (2K, tile) f32
    # TODO(synk): subclass policies also emit action_log_std/action_std;
    # forward only returns action_mean, so they are omitted here.


# --------------------------------------------------------------------------
# Parameter packing: transpose to (out, in), fuse mu|logvar head, split and
# zero-embed the decoder first layer.  Done once per params (outside hot loop).
# --------------------------------------------------------------------------
def _pack_params(params, *, state_size, c_size, policy_state_size, mxu_dtype):
    Sx, Sc, P = state_size, c_size, policy_state_size
    H = params["we1"].shape[1]
    K = params["wmu"].shape[1]
    f32 = jnp.float32

    w1 = params["we1"].T.astype(mxu_dtype)                       # (H, Sx+Sc)
    b1 = params["be1"].reshape(H, 1).astype(f32)
    w2 = params["we2"].T.astype(mxu_dtype)                       # (H, H)
    b2 = params["be2"].reshape(H, 1).astype(f32)
    wml = jnp.concatenate([params["wmu"], params["wlv"]],
                          axis=1).T.astype(mxu_dtype)            # (2K, H)
    bml = jnp.concatenate([params["bmu"], params["blv"]],
                          axis=1).reshape(2 * K, 1).astype(f32)

    wp1 = params["wp1"]                                          # (P+K, H)
    wp1x_t = wp1[:P, :].T                                        # (H, P)
    wp1x = (jnp.zeros((H, Sx + Sc), f32)
            .at[:, Sx - P:Sx].set(wp1x_t).astype(mxu_dtype))     # (H, Sx+Sc)
    wp1z = wp1[P:, :].T.astype(mxu_dtype)                        # (H, K)
    bp1 = params["bp1"].reshape(H, 1).astype(f32)
    wp2 = params["wp2"].T.astype(mxu_dtype)                      # (H, H)
    bp2 = params["bp2"].reshape(H, 1).astype(f32)
    wam = params["wam"].T.astype(mxu_dtype)                      # (A, H)
    bam = params["bam"].reshape(-1, 1).astype(f32)               # (A, 1)
    return (w1, b1, w2, b2, wml, bml, wp1x, wp1z, bp1, wp2, bp2, wam, bam)


# --------------------------------------------------------------------------
# Wrapper
# --------------------------------------------------------------------------
def vae_forward(x, c, g, params, *, policy_state_size, posterior_latent_size,
                eps=None, training=True, row_tile=1024,
                mxu_dtype=jnp.bfloat16):
    """Returns (decoder_output_1, decoder_output_2, mu, logvar) like torch."""
    del g  # unused by the torch forward as well
    B, T, Sx = x.shape
    _, _, Sc = c.shape
    K = posterior_latent_size
    A = params["wam"].shape[1]
    F = Sx + Sc
    N = B * T

    if training and eps is None:
        # TODO(synk): could generate eps in-kernel via pltpu.prng_seed /
        # pltpu.stateful_normal instead of requiring it from the caller.
        raise ValueError("training=True requires eps ~ N(0,1) of shape "
                         "(B, T, posterior_latent_size)")

    # Lane-dense feature-major layout: pad rows to a multiple of the tile
    # (tile itself a multiple of 128 so rows map densely onto lanes).
    tile = max(128, min(int(row_tile), pl.cdiv(N, 128) * 128))
    Np = pl.cdiv(N, tile) * tile

    xc = jnp.concatenate([x.reshape(N, Sx), c.reshape(N, Sc)],
                         axis=-1).astype(mxu_dtype)
    xc = jnp.pad(xc, ((0, Np - N), (0, 0))).T                    # (F, Np)

    packed = _pack_params(params, state_size=Sx, c_size=Sc,
                          policy_state_size=policy_state_size,
                          mxu_dtype=mxu_dtype)

    inputs = [xc]
    in_specs = [pl.BlockSpec((F, tile), lambda i: (0, i))]
    if training:
        epsT = jnp.pad(eps.reshape(N, K).astype(jnp.float32),
                       ((0, Np - N), (0, 0))).T                  # (K, Np)
        inputs.append(epsT)
        in_specs.append(pl.BlockSpec((K, tile), lambda i: (0, i)))
    inputs.extend(packed)
    # Replicated params: constant index_map -> fetched once, not per step.
    in_specs.extend(pl.BlockSpec(p.shape, lambda i: (0, 0)) for p in packed)

    out_specs = [pl.BlockSpec((A, tile), lambda i: (0, i)),
                 pl.BlockSpec((2 * K, tile), lambda i: (0, i))]
    out_shape = (jax.ShapeDtypeStruct((A, Np), jnp.float32),
                 jax.ShapeDtypeStruct((2 * K, Np), jnp.float32))

    kernel = functools.partial(_vae_kernel, training, mxu_dtype)

    act, ml = pl.pallas_call(
        kernel,
        grid=(Np // tile,),
        in_specs=in_specs,
        out_specs=out_specs,
        out_shape=out_shape,
        compiler_params=pltpu.CompilerParams(
            dimension_semantics=("parallel",)),
    )(*inputs)

    action_mean = act[:, :N].T.reshape(B, T, A)
    mu = ml[:K, :N].T.reshape(B, T, K)
    logvar = ml[K:, :N].T.reshape(B, T, K)
    return action_mean, None, mu, logvar


# --------------------------------------------------------------------------
# Deterministic parameter init (torch-linear orientation: (din, dout))
# --------------------------------------------------------------------------
def init_params(key, state_size, c_size, hidden, latent,
                policy_state_size, action_size):
    ks = jax.random.split(key, 7)

    def lin(k, din, dout):
        w = jax.random.normal(k, (din, dout), jnp.float32) / jnp.sqrt(
            jnp.float32(din))
        b = jnp.zeros((1, dout), jnp.float32)
        return w, b

    we1, be1 = lin(ks[0], state_size + c_size, hidden)
    we2, be2 = lin(ks[1], hidden, hidden)
    wmu, bmu = lin(ks[2], hidden, latent)
    wlv, blv = lin(ks[3], hidden, latent)
    wp1, bp1 = lin(ks[4], policy_state_size + latent, hidden)
    wp2, bp2 = lin(ks[5], hidden, hidden)
    wam, bam = lin(ks[6], hidden, action_size)
    return dict(we1=we1, be1=be1, we2=we2, be2=be2, wmu=wmu, bmu=bmu,
                wlv=wlv, blv=blv, wp1=wp1, bp1=bp1, wp2=wp2, bp2=bp2,
                wam=wam, bam=bam)


# --------------------------------------------------------------------------
# Pure-JAX reference (for a loose sanity check against the fused kernel)
# --------------------------------------------------------------------------
def _ref_forward(x, c, eps, params, P, training):
    xc = jnp.concatenate([x, c], -1)
    h = jnp.tanh(xc @ params["we1"] + params["be1"])
    h = jnp.tanh(h @ params["we2"] + params["be2"])
    mu = h @ params["wmu"] + params["bmu"]
    logvar = h @ params["wlv"] + params["blv"]
    z = mu + eps * jnp.exp(0.5 * logvar) if training else mu
    d = jnp.concatenate([x[..., -P:], z], -1)
    p = jnp.tanh(d @ params["wp1"] + params["bp1"])
    p = jnp.tanh(p @ params["wp2"] + params["bp2"])
    return p @ params["wam"] + params["bam"], mu, logvar


if __name__ == "__main__":
    # Small shapes consistent with the module's (B, T, feature) convention.
    B, T = 2, 8
    STATE = 8                  # x feature size
    C_SIZE = 8                 # c feature size (context + latent slot)
    POLICY_STATE = 4           # policy_state_size
    POST_LATENT = 4            # posterior_latent_size
    POLICY_OUT = 4             # policy_output_size
    HIDDEN = 32

    key = jax.random.PRNGKey(0)
    kx, kc, kg, keps, kp = jax.random.split(key, 5)
    x = jax.random.normal(kx, (B, T, STATE), jnp.float32)
    c = jax.random.normal(kc, (B, T, C_SIZE), jnp.float32)
    g = jax.random.normal(kg, (B, T, POST_LATENT), jnp.float32)  # unused
    eps = jax.random.normal(keps, (B, T, POST_LATENT), jnp.float32)

    params = init_params(kp, STATE, C_SIZE, HIDDEN, POST_LATENT,
                         POLICY_STATE, POLICY_OUT)

    # --- training mode (eps streamed) ---
    out1, out2, mu, logvar = vae_forward(
        x, c, g, params,
        policy_state_size=POLICY_STATE,
        posterior_latent_size=POST_LATENT,
        eps=eps, training=True)
    jax.block_until_ready((out1, mu, logvar))
    assert out1.shape == (B, T, POLICY_OUT)
    assert out2 is None
    assert mu.shape == (B, T, POST_LATENT)
    assert logvar.shape == (B, T, POST_LATENT)

    r_act, r_mu, r_lv = _ref_forward(x, c, eps, params, POLICY_STATE, True)
    assert float(jnp.max(jnp.abs(out1 - r_act))) < 1e-1
    assert float(jnp.max(jnp.abs(mu - r_mu))) < 1e-1
    assert float(jnp.max(jnp.abs(logvar - r_lv))) < 1e-1

    # --- eval mode (no eps input at all) ---
    e_out1, e_out2, e_mu, e_lv = vae_forward(
        x, c, g, params,
        policy_state_size=POLICY_STATE,
        posterior_latent_size=POST_LATENT,
        eps=None, training=False)
    jax.block_until_ready((e_out1, e_mu, e_lv))
    r_act_e, _, _ = _ref_forward(x, c, eps, params, POLICY_STATE, False)
    assert e_out1.shape == (B, T, POLICY_OUT)
    assert float(jnp.max(jnp.abs(e_out1 - r_act_e))) < 1e-1

    print("KERNEL_OK")
</pallas_src>

<mosaic_0001>
module attributes {stable_mosaic.version = 11 : i64} {
  func.func @_vae_kernel(%arg0: i32, %arg1: memref<16x128xbf16, #tpu.memory_space<vmem>>, %arg2: memref<4x128xf32, #tpu.memory_space<vmem>>, %arg3: memref<32x16xbf16, #tpu.memory_space<vmem>>, %arg4: memref<32x1xf32, #tpu.memory_space<vmem>>, %arg5: memref<32x32xbf16, #tpu.memory_space<vmem>>, %arg6: memref<32x1xf32, #tpu.memory_space<vmem>>, %arg7: memref<8x32xbf16, #tpu.memory_space<vmem>>, %arg8: memref<8x1xf32, #tpu.memory_space<vmem>>, %arg9: memref<32x16xbf16, #tpu.memory_space<vmem>>, %arg10: memref<32x4xbf16, #tpu.memory_space<vmem>>, %arg11: memref<32x1xf32, #tpu.memory_space<vmem>>, %arg12: memref<32x32xbf16, #tpu.memory_space<vmem>>, %arg13: memref<32x1xf32, #tpu.memory_space<vmem>>, %arg14: memref<4x32xbf16, #tpu.memory_space<vmem>>, %arg15: memref<4x1xf32, #tpu.memory_space<vmem>>, %arg16: memref<4x128xf32, #tpu.memory_space<vmem>>, %arg17: memref<8x128xf32, #tpu.memory_space<vmem>>) attributes {dimension_semantics = [#tpu.dimension_semantics<parallel>], iteration_bounds = array<i64: 1>, scalar_prefetch = 0 : i64, scratch_operands = 0 : i64, tpu.core_type = #tpu.core_type<tc>, window_params = [{transform_indices = @transform_0, window_bounds = array<i64: 16, 128>}, {transform_indices = @transform_1, window_bounds = array<i64: 4, 128>}, {pipeline_mode = #tpu.pipeline_mode<synchronous>, transform_indices = @transform_2, window_bounds = array<i64: 32, 16>}, {pipeline_mode = #tpu.pipeline_mode<synchronous>, transform_indices = @transform_3, window_bounds = array<i64: 32, 1>}, {pipeline_mode = #tpu.pipeline_mode<synchronous>, transform_indices = @transform_4, window_bounds = array<i64: 32, 32>}, {pipeline_mode = #tpu.pipeline_mode<synchronous>, transform_indices = @transform_5, window_bounds = array<i64: 32, 1>}, {pipeline_mode = #tpu.pipeline_mode<synchronous>, transform_indices = @transform_6, window_bounds = array<i64: 8, 32>}, {pipeline_mode = #tpu.pipeline_mode<synchronous>, transform_indices = @transform_7, window_bounds = array<i64: 8, 1>}, {pipeline_mode = #tpu.pipeline_mode<synchronous>, transform_indices = @transform_8, window_bounds = array<i64: 32, 16>}, {pipeline_mode = #tpu.pipeline_mode<synchronous>, transform_indices = @transform_9, window_bounds = array<i64: 32, 4>}, {pipeline_mode = #tpu.pipeline_mode<synchronous>, transform_indices = @transform_10, window_bounds = array<i64: 32, 1>}, {pipeline_mode = #tpu.pipeline_mode<synchronous>, transform_indices = @transform_11, window_bounds = array<i64: 32, 32>}, {pipeline_mode = #tpu.pipeline_mode<synchronous>, transform_indices = @transform_12, window_bounds = array<i64: 32, 1>}, {pipeline_mode = #tpu.pipeline_mode<synchronous>, transform_indices = @transform_13, window_bounds = array<i64: 4, 32>}, {pipeline_mode = #tpu.pipeline_mode<synchronous>, transform_indices = @transform_14, window_bounds = array<i64: 4, 1>}, {transform_indices = @transform_15, window_bounds = array<i64: 4, 128>}, {transform_indices = @transform_16, window_bounds = array<i64: 8, 128>}]} {
    %c0 = arith.constant 0 : index
    %c0_0 = arith.constant 0 : index
    %0 = vector.load %arg1[%c0, %c0_0] : memref<16x128xbf16, #tpu.memory_space<vmem>>, vector<16x128xbf16>
    %c0_1 = arith.constant 0 : index
    %c0_2 = arith.constant 0 : index
    %1 = vector.load %arg3[%c0_1, %c0_2] : memref<32x16xbf16, #tpu.memory_space<vmem>>, vector<32x16xbf16>
    %cst = arith.constant dense<0.000000e+00> : vector<32x128xf32>
    %2 = tpu.matmul %1, %0, %cst {dimension_numbers = #tpu.dot_dimension_numbers<[1], [0], [0], [1], [0, 0, 1, 1], [], []>} : vector<32x16xbf16>, vector<16x128xbf16>, vector<32x128xf32> -> vector<32x128xf32>
    %c0_3 = arith.constant 0 : index
    %c0_4 = arith.constant 0 : index
    %3 = vector.load %arg4[%c0_3, %c0_4] : memref<32x1xf32, #tpu.memory_space<vmem>>, vector<32x1xf32>
    %4 = vector.broadcast %3 : vector<32x1xf32> to vector<32x128xf32>
    %5 = arith.addf %2, %4 : vector<32x128xf32>
    %6 = math.tanh %5 : vector<32x128xf32>
    %c0_5 = arith.constant 0 : index
    %c0_6 = arith.constant 0 : index
    %7 = vector.load %arg5[%c0_5, %c0_6] : memref<32x32xbf16, #tpu.memory_space<vmem>>, vector<32x32xbf16>
    %8 = arith.truncf %6 : vector<32x128xf32> to vector<32x128xbf16>
    %cst_7 = arith.constant dense<0.000000e+00> : vector<32x128xf32>
    %9 = tpu.matmul %7, %8, %cst_7 {dimension_numbers = #tpu.dot_dimension_numbers<[1], [0], [0], [1], [0, 0, 1, 1], [], []>} : vector<32x32xbf16>, vector<32x128xbf16>, vector<32x128xf32> -> vector<32x128xf32>
    %c0_8 = arith.constant 0 : index
    %c0_9 = arith.constant 0 : index
    %10 = vector.load %arg6[%c0_8, %c0_9] : memref<32x1xf32, #tpu.memory_space<vmem>>, vector<32x1xf32>
    %11 = vector.broadcast %10 : vector<32x1xf32> to vector<32x128xf32>
    %12 = arith.addf %9, %11 : vector<32x128xf32>
    %13 = math.tanh %12 : vector<32x128xf32>
    %c0_10 = arith.constant 0 : index
    %c0_11 = arith.constant 0 : index
    %14 = vector.load %arg7[%c0_10, %c0_11] : memref<8x32xbf16, #tpu.memory_space<vmem>>, vector<8x32xbf16>
    %15 = arith.truncf %13 : vector<32x128xf32> to vector<32x128xbf16>
    %cst_12 = arith.constant dense<0.000000e+00> : vector<8x128xf32>
    %16 = tpu.matmul %14, %15, %cst_12 {dimension_numbers = #tpu.dot_dimension_numbers<[1], [0], [0], [1], [0, 0, 1, 1], [], []>} : vector<8x32xbf16>, vector<32x128xbf16>, vector<8x128xf32> -> vector<8x128xf32>
    %c0_13 = arith.constant 0 : index
    %c0_14 = arith.constant 0 : index
    %17 = vector.load %arg8[%c0_13, %c0_14] : memref<8x1xf32, #tpu.memory_space<vmem>>, vector<8x1xf32>
    %18 = vector.broadcast %17 : vector<8x1xf32> to vector<8x128xf32>
    %19 = arith.addf %16, %18 : vector<8x128xf32>
    %20 = vector.extract_strided_slice %19 {offsets = [0, 0], sizes = [4, 128], strides = [1, 1]} : vector<8x128xf32> to vector<4x128xf32>
    %21 = vector.extract_strided_slice %19 {offsets = [4, 0], sizes = [4, 128], strides = [1, 1]} : vector<8x128xf32> to vector<4x128xf32>
    %c0_15 = arith.constant 0 : index
    %c0_16 = arith.constant 0 : index
    %22 = vector.load %arg2[%c0_15, %c0_16] : memref<4x128xf32, #tpu.memory_space<vmem>>, vector<4x128xf32>
    %cst_17 = arith.constant 5.000000e-01 : f32
    %23 = vector.broadcast %cst_17 : f32 to vector<4x128xf32>
    %24 = arith.mulf %23, %21 : vector<4x128xf32>
    %25 = math.exp %24 : vector<4x128xf32>
    %26 = arith.mulf %22, %25 : vector<4x128xf32>
    %27 = arith.addf %20, %26 : vector<4x128xf32>
    %c0_18 = arith.constant 0 : index
    %c0_19 = arith.constant 0 : index
    %28 = vector.load %arg9[%c0_18, %c0_19] : memref<32x16xbf16, #tpu.memory_space<vmem>>, vector<32x16xbf16>
    %cst_20 = arith.constant dense<0.000000e+00> : vector<32x128xf32>
    %29 = tpu.matmul %28, %0, %cst_20 {dimension_numbers = #tpu.dot_dimension_numbers<[1], [0], [0], [1], [0, 0, 1, 1], [], []>} : vector<32x16xbf16>, vector<16x128xbf16>, vector<32x128xf32> -> vector<32x128xf32>
    %c0_21 = arith.constant 0 : index
    %c0_22 = arith.constant 0 : index
    %30 = vector.load %arg10[%c0_21, %c0_22] : memref<32x4xbf16, #tpu.memory_space<vmem>>, vector<32x4xbf16>
    %31 = arith.truncf %27 : vector<4x128xf32> to vector<4x128xbf16>
    %cst_23 = arith.constant dense<0.000000e+00> : vector<32x128xf32>
    %32 = tpu.matmul %30, %31, %cst_23 {dimension_numbers = #tpu.dot_dimension_numbers<[1], [0], [0], [1], [0, 0, 1, 1], [], []>} : vector<32x4xbf16>, vector<4x128xbf16>, vector<32x128xf32> -> vector<32x128xf32>
    %33 = arith.addf %29, %32 : vector<32x128xf32>
    %c0_24 = arith.constant 0 : index
    %c0_25 = arith.constant 0 : index
    %34 = vector.load %arg11[%c0_24, %c0_25] : memref<32x1xf32, #tpu.memory_space<vmem>>, vector<32x1xf32>
    %35 = vector.broadcast %34 : vector<32x1xf32> to vector<32x128xf32>
    %36 = arith.addf %33, %35 : vector<32x128xf32>
    %37 = math.tanh %36 : vector<32x128xf32>
    %c0_26 = arith.constant 0 : index
    %c0_27 = arith.constant 0 : index
    %38 = vector.load %arg12[%c0_26, %c0_27] : memref<32x32xbf16, #tpu.memory_space<vmem>>, vector<32x32xbf16>
    %39 = arith.truncf %37 : vector<32x128xf32> to vector<32x128xbf16>
    %cst_28 = arith.constant dense<0.000000e+00> : vector<32x128xf32>
    %40 = tpu.matmul %38, %39, %cst_28 {dimension_numbers = #tpu.dot_dimension_numbers<[1], [0], [0], [1], [0, 0, 1, 1], [], []>} : vector<32x32xbf16>, vector<32x128xbf16>, vector<32x128xf32> -> vector<32x128xf32>
    %c0_29 = arith.constant 0 : index
    %c0_30 = arith.constant 0 : index
    %41 = vector.load %arg13[%c0_29, %c0_30] : memref<32x1xf32, #tpu.memory_space<vmem>>, vector<32x1xf32>
    %42 = vector.broadcast %41 : vector<32x1xf32> to vector<32x128xf32>
    %43 = arith.addf %40, %42 : vector<32x128xf32>
    %44 = math.tanh %43 : vector<32x128xf32>
    %c0_31 = arith.constant 0 : index
    %c0_32 = arith.constant 0 : index
    %45 = vector.load %arg14[%c0_31, %c0_32] : memref<4x32xbf16, #tpu.memory_space<vmem>>, vector<4x32xbf16>
    %46 = arith.truncf %44 : vector<32x128xf32> to vector<32x128xbf16>
    %cst_33 = arith.constant dense<0.000000e+00> : vector<4x128xf32>
    %47 = tpu.matmul %45, %46, %cst_33 {dimension_numbers = #tpu.dot_dimension_numbers<[1], [0], [0], [1], [0, 0, 1, 1], [], []>} : vector<4x32xbf16>, vector<32x128xbf16>, vector<4x128xf32> -> vector<4x128xf32>
    %c0_34 = arith.constant 0 : index
    %c0_35 = arith.constant 0 : index
    %48 = vector.load %arg15[%c0_34, %c0_35] : memref<4x1xf32, #tpu.memory_space<vmem>>, vector<4x1xf32>
    %49 = vector.broadcast %48 : vector<4x1xf32> to vector<4x128xf32>
    %50 = arith.addf %47, %49 : vector<4x128xf32>
    %c0_36 = arith.constant 0 : index
    %c0_37 = arith.constant 0 : index
    %51 = vector.load %arg16[%c0_36, %c0_37] : memref<4x128xf32, #tpu.memory_space<vmem>>, vector<4x128xf32>
    tpu.vector_store %arg16[%c0_36, %c0_37], %50 {strides = array<i32>} : memref<4x128xf32, #tpu.memory_space<vmem>>, vector<4x128xf32>,
    %c0_38 = arith.constant 0 : index
    %c0_39 = arith.constant 0 : index
    %52 = vector.load %arg17[%c0_38, %c0_39] : memref<8x128xf32, #tpu.memory_space<vmem>>, vector<8x128xf32>
    tpu.vector_store %arg17[%c0_38, %c0_39], %19 {strides = array<i32>} : memref<8x128xf32, #tpu.memory_space<vmem>>, vector<8x128xf32>,
    return
  }
  func.func @transform_0(%arg0: i32) -> (i32, i32) {
    %c0_i32 = arith.constant 0 : i32
    %c0_i32_0 = arith.constant 0 : i32
    return %c0_i32, %arg0 : i32, i32
  }
  func.func @transform_1(%arg0: i32) -> (i32, i32) {
    %c0_i32 = arith.constant 0 : i32
    %c0_i32_0 = arith.constant 0 : i32
    return %c0_i32, %arg0 : i32, i32
  }
  func.func @transform_2(%arg0: i32) -> (i32, i32) {
    %c0_i32 = arith.constant 0 : i32
    %c0_i32_0 = arith.constant 0 : i32
    %c0_i32_1 = arith.constant 0 : i32
    return %c0_i32, %c0_i32_0 : i32, i32
  }
  func.func @transform_3(%arg0: i32) -> (i32, i32) {
    %c0_i32 = arith.constant 0 : i32
    %c0_i32_0 = arith.constant 0 : i32
    %c0_i32_1 = arith.constant 0 : i32
    return %c0_i32, %c0_i32_0 : i32, i32
  }
  func.func @transform_4(%arg0: i32) -> (i32, i32) {
    %c0_i32 = arith.constant 0 : i32
    %c0_i32_0 = arith.constant 0 : i32
    %c0_i32_1 = arith.constant 0 : i32
    return %c0_i32, %c0_i32_0 : i32, i32
  }
  func.func @transform_5(%arg0: i32) -> (i32, i32) {
    %c0_i32 = arith.constant 0 : i32
    %c0_i32_0 = arith.constant 0 : i32
    %c0_i32_1 = arith.constant 0 : i32
    return %c0_i32, %c0_i32_0 : i32, i32
  }
  func.func @transform_6(%arg0: i32) -> (i32, i32) {
    %c0_i32 = arith.constant 0 : i32
    %c0_i32_0 = arith.constant 0 : i32
    %c0_i32_1 = arith.constant 0 : i32
    return %c0_i32, %c0_i32_0 : i32, i32
  }
  func.func @transform_7(%arg0: i32) -> (i32, i32) {
    %c0_i32 = arith.constant 0 : i32
    %c0_i32_0 = arith.constant 0 : i32
    %c0_i32_1 = arith.constant 0 : i32
    return %c0_i32, %c0_i32_0 : i32, i32
  }
  func.func @transform_8(%arg0: i32) -> (i32, i32) {
    %c0_i32 = arith.constant 0 : i32
    %c0_i32_0 = arith.constant 0 : i32
    %c0_i32_1 = arith.constant 0 : i32
    return %c0_i32, %c0_i32_0 : i32, i32
  }
  func.func @transform_9(%arg0: i32) -> (i32, i32) {
    %c0_i32 = arith.constant 0 : i32
    %c0_i32_0 = arith.constant 0 : i32
    %c0_i32_1 = arith.constant 0 : i32
    return %c0_i32, %c0_i32_0 : i32, i32
  }
  func.func @transform_10(%arg0: i32) -> (i32, i32) {
    %c0_i32 = arith.constant 0 : i32
    %c0_i32_0 = arith.constant 0 : i32
    %c0_i32_1 = arith.constant 0 : i32
    return %c0_i32, %c0_i32_0 : i32, i32
  }
  func.func @transform_11(%arg0: i32) -> (i32, i32) {
    %c0_i32 = arith.constant 0 : i32
    %c0_i32_0 = arith.constant 0 : i32
    %c0_i32_1 = arith.constant 0 : i32
    return %c0_i32, %c0_i32_0 : i32, i32
  }
  func.func @transform_12(%arg0: i32) -> (i32, i32) {
    %c0_i32 = arith.constant 0 : i32
    %c0_i32_0 = arith.constant 0 : i32
    %c0_i32_1 = arith.constant 0 : i32
    return %c0_i32, %c0_i32_0 : i32, i32
  }
  func.func @transform_13(%arg0: i32) -> (i32, i32) {
    %c0_i32 = arith.constant 0 : i32
    %c0_i32_0 = arith.constant 0 : i32
    %c0_i32_1 = arith.constant 0 : i32
    return %c0_i32, %c0_i32_0 : i32, i32
  }
  func.func @transform_14(%arg0: i32) -> (i32, i32) {
    %c0_i32 = arith.constant 0 : i32
    %c0_i32_0 = arith.constant 0 : i32
    %c0_i32_1 = arith.constant 0 : i32
    return %c0_i32, %c0_i32_0 : i32, i32
  }
  func.func @transform_15(%arg0: i32) -> (i32, i32) {
    %c0_i32 = arith.constant 0 : i32
    %c0_i32_0 = arith.constant 0 : i32
    return %c0_i32, %arg0 : i32, i32
  }
  func.func @transform_16(%arg0: i32) -> (i32, i32) {
    %c0_i32 = arith.constant 0 : i32
    %c0_i32_0 = arith.constant 0 : i32
    return %c0_i32, %arg0 : i32, i32
  }
}

</mosaic_0001>

<bundles_post_ra>
// kernel: tpu_custom_call.1
= control target key start
LH: loop header
LB: loop body
LE: loop exit
PB: predicated region body
PF: predicated region fallthrough
CT: control target
= control target key end

     0   :  { %s1090_s0 = inlined_call_operand.vmem [shape: bf16[16,128], index: 0, kind: input, shape index: {}]   ;;  %s1091_s1 = inlined_call_operand.vmem [shape: f32[4,128], index: 1, kind: input, shape index: {}]   ;;  %s1092_s2 = inlined_call_operand.vmem [shape: bf16[32,16], index: 2, kind: input, shape index: {}]   ;;  %s1093_s3 = inlined_call_operand.vmem [shape: f32[32,1], index: 3, kind: input, shape index: {}]   ;;  %s1094_s4 = inlined_call_operand.vmem [shape: bf16[32,32], index: 4, kind: input, shape index: {}]   ;;  %s1095_s5 = inlined_call_operand.vmem [shape: f32[32,1], index: 5, kind: input, shape index: {}]   ;;  %s1096_s6 = inlined_call_operand.vmem [shape: bf16[8,32], index: 6, kind: input, shape index: {}]   ;;  %s1097_s7 = inlined_call_operand.vmem [shape: f32[8,1], index: 7, kind: input, shape index: {}]   ;;  %s1098_s8 = inlined_call_operand.vmem [shape: bf16[32,16], index: 8, kind: input, shape index: {}]   ;;  %s1099_s9 = inlined_call_operand.vmem [shape: bf16[32,4], index: 9, kind: input, shape index: {}]   ;;  %s1100_s10 = inlined_call_operand.vmem [shape: f32[32,1], index: 10, kind: input, shape index: {}]   ;;  %s1101_s11 = inlined_call_operand.vmem [shape: bf16[32,32], index: 11, kind: input, shape index: {}]   ;;  %s1102_s12 = inlined_call_operand.vmem [shape: f32[32,1], index: 12, kind: input, shape index: {}]   ;;  %s1103_s13 = inlined_call_operand.vmem [shape: bf16[4,32], index: 13, kind: input, shape index: {}]   ;;  %s1104_s14 = inlined_call_operand.vmem [shape: f32[4,1], index: 14, kind: input, shape index: {}]   ;;  %s1105_s15 = inlined_call_operand.hbm [shape: f32[4,128], index: 15, kind: output, shape index: {0}]   ;;  %s1106_s16 = inlined_call_operand.hbm [shape: f32[8,128], index: 16, kind: output, shape index: {1}]  }
   0x1   :  { %1107 = sst [smem:[#allocation8_spill]] %s1090_s0 }
   0x2   :  { %22 = vsyncpa [#allocation3], 0  ;;  %s1108_s23 = sld [smem:[#allocation8_spill]]  ;;  %vm101_vm0 = vcmask 130048   ;;  %v784_v1 = vld [vmem:[%s1092_s2] sm:$0xff]   ;;  %v785_v2 = vld [vmem:[%s1092_s2 + $0x8] sm:$0xff]  }
   0x3   :  { %v872_v3 = vmov 0   ;;  %727 = vmatprep.mubr.msk.bf16.mxu0 %vm101_vm0, %v784_v1  ;;  %v63_v4 = vld [vmem:[%s1093_s3 + $0x10] sm:$0xff]  ;;  %v61_v5 = vld [vmem:[%s1093_s3] sm:$0xff]  ;;  %v64_v6 = vld [vmem:[%s1093_s3 + $0x18] sm:$0xff] }
   0x4   :  { %781 = vset.pattern.permute.xlu0 %v872_v3  ;;  %782 = vset.pattern.permute.xlu1 %v872_v3  ;;  %v62_v7 = vld [vmem:[%s1093_s3 + $0x8] sm:$0xff]  ;;  %v169_v8 = vld [vmem:[%s1095_s5 + $0x10] sm:$0xff]  ;;  %v170_v9 = vld [vmem:[%s1095_s5 + $0x18] sm:$0xff] }
   0x5   :  { %77 = vperm.xlu0 %781, %v63_v4   ;;  %67 = vperm.xlu1 %782, %v61_v5   ;;  %v167_v10 = vld [vmem:[%s1095_s5] sm:$0xff]  ;;  %v168_v11 = vld [vmem:[%s1095_s5 + $0x8] sm:$0xff] }
   0x8   :  { %v965_v0 = vld [vmem:[%s1108_s23] sm:$0xff]  }
   0x9   :  { %725 = vmatprep.subr.bf16.mxu0 %v965_v0  ;;  %82 = vperm.xlu0 %781, %v64_v6  }
   0xa   :  { %726 = vmatpush3.bf16.msra.mxu0 %v965_v0  ;;  %72 = vperm.xlu1 %782, %v62_v7  }
   0xd   :  { %728 = vmatmul.mubr.msk.bf16.vlgmr.msra.gmra.mxu0 %vm101_vm0, %v785_v2  ;;  %183 = vperm.xlu0 %781, %v169_v8  }
   0xe   :  { %188 = vperm.xlu1 %782, %v170_v9  }
   0xf   :  { %23 = vsyncpa [#allocation5], 0  ;;  %v264_v12 = vld [vmem:[%s1097_s7] sm:$0xff]  ;;  %v468_v13 = vld [vmem:[%s1100_s10 + $0x10] sm:$0xff]  ;;  %vm201_vm1 = vcmask 261120   ;;  %v873_v42 = vmov 0.0  }
  0x10   :  { %v469_v14 = vld [vmem:[%s1100_s10 + $0x18] sm:$0xff]  ;;  %v466_v15 = vld [vmem:[%s1100_s10] sm:$0xff]  ;;  %v467_v16 = vld [vmem:[%s1100_s10 + $0x8] sm:$0xff]  ;;  %739 = vmatprep.subr.bf16.mxu0 %v873_v42  ;;  %vm874_vm2 = vmmov 0   ;;  %vm341_vm3 = vcmask 31744   ;;  %vm348_vm4 = vcmask 1041408  }
  0x11   :  { %173 = vperm.xlu0 %781, %v167_v10   ;;  %v506_v17 = vld [vmem:[%s1102_s12 + $0x10] sm:$0xff]  ;;  %v507_v18 = vld [vmem:[%s1102_s12 + $0x18] sm:$0xff]  ;;  %v504_v19 = vld [vmem:[%s1102_s12] sm:$0xff]  ;;  %743 = vmatprep.mubr.msk.bf16.mxu0 %vm874_vm2, %v873_v42  ;;  %s875_s23 = smov [#allocation4]  }
  0x12   :  { %178 = vperm.xlu1 %782, %v168_v11   ;;  %v505_v20 = vld [vmem:[%s1102_s12 + $0x8] sm:$0xff]  ;;  %v600_v21 = vld [vmem:[%s1104_s14] sm:$0xf]  ;;  %s667_s24 = sshll.u32 %s875_s23, 4  ;;  %s668_s24 = int_to_ptr.vmem [resolvable:$true] %s667_s24 }
  0x13   :  { %v786_v22 = vld [vmem:[%s1094_s4] sm:$0xff]   ;;  %v787_v41 = vld [vmem:[%s1094_s4 + $0x8] sm:$0xff]   ;;  %s828_s25 = scalar_lea.vmem %s668_s24, 128  ;;  %p833_p1 = scmp.lt.s32.totalorder %s668_s24, %s668_s24 }
  0x14   :  { %735 = vmatprep.mubr.msk.bf16.mxu1 %vm201_vm1, %v786_v22  ;;  %v261_v61 = vld [vmem:[%s1096_s6] sm:$0xf]  ;;  %v789_v63 = vld [vmem:[%s1098_s8 + $0x8] sm:$0xff]   ;;  %p829_p0 = scmp.ne.s32.totalorder %s668_s24, %s828_s25  ;;  %p834_p2 = scmp.lt.s32.totalorder %s828_s25, %s828_s25 }
  0x15   :  { %267 = vperm.xlu0 %781, %v264_v12   ;;  %v788_v62 = vld [vmem:[%s1098_s8] sm:$0xff]  }
  0x16   :  { %482 = vperm.xlu1 %782, %v468_v13   ;;  %v313_v10 = vld [vmem:[%s1091_s1] sm:$0xf]  ;;  %p835_p3 = por %p834_p2, %p833_p1 }
  0x18   :  { %p836_p4 = pnand %p835_p3, %p829_p0 }
  0x19   :  { %487 = vperm.xlu0 %781, %v469_v14  }
  0x1a   :  { %472 = vperm.xlu1 %782, %v466_v15  }
  0x1d   :  { %477 = vperm.xlu0 %781, %v467_v16   ;;  %v791_v16 = vld [vmem:[%s1099_s9 + $0x8] sm:$0xff]  }
  0x1e   :  { %520 = vperm.xlu1 %782, %v506_v17   ;;  %v792_v17 = vld [vmem:[%s1101_s11] sm:$0xff]  }
  0x21   :  { %525 = vperm.xlu0 %781, %v507_v18  }
  0x22   :  { %510 = vperm.xlu1 %782, %v504_v19  }
  0x25   :  { %515 = vperm.xlu0 %781, %v505_v20  }
  0x26   :  { %603 = vperm.xlu1 %782, %v600_v21  }
  0x80   :  { %v78_v23 = vpop.permute.xlu0 %77  ;;  %v68_v24 = vpop.permute.xlu1 %67 }
  0x84   :  { %v83_v28 = vpop.permute.xlu0 %82 }
  0x85   :  { %v73_v32 = vpop.permute.xlu1 %72 }
  0x88   :  { %v184_v43 = vpop.permute.xlu0 %183 }
  0x89   :  { %v189_v44 = vpop.permute.xlu1 %188 }
  0x8c   :  { %v174_v49 = vpop.permute.xlu0 %173 }
  0x8d   :  { %v179_v51 = vpop.permute.xlu1 %178 }
  0x90   :  { %v268_v1 = vpop.permute.xlu0 %267 }
  0x91   :  { %v483_v20 = vpop.permute.xlu1 %482 }
  0x94   :  { %v488_v22 = vpop.permute.xlu0 %487 }
  0xcd   :  { %v729_v25 = vpop.f32.mrf.mxu0 }
  0xce   :  { %v151_v26 = vadd.f32 %v729_v25, %v78_v23 }
  0xcf   :  { %v142_v27 = vpop.f32.mrf.mxu0 }
  0xd0   :  { %v143_v29 = vadd.f32 %v142_v27, %v68_v24  ;;  %794 = vtanh.f32 %v151_v26 }
  0xd1   :  { %v730_v30 = vpop.f32.mrf.mxu0 }
  0xd2   :  { %v154_v31 = vadd.f32 %v730_v30, %v83_v28 }
  0xd3   :  { %v145_v33 = vpop.f32.mrf.mxu0 }
  0xd4   :  { %796 = vtanh.f32 %v154_v31  ;;  %v146_v34 = vadd.f32 %v145_v33, %v73_v32 }
  0xd5   :  { %798 = vtanh.f32 %v143_v29  ;;  %v473_v29 = vpop.permute.xlu1 %472 }
  0xd6   :  { %800 = vtanh.f32 %v146_v34 }
  0xdd   :  { %v795_v35 = vpop.eup %794 }
  0xe1   :  { %v797_v36 = vpop.eup %796 }
  0xe2   :  { %v799_v37 = vpop.eup %798  ;;  %v166_v38 = vpack.c.bf16 %v797_v36, %v795_v35  ;;  %v478_v36 = vpop.permute.xlu0 %477 }
  0xe3   :  { %v801_v39 = vpop.eup %800 }
  0xe4   :  { %731 = vmatprep.subr.bf16.mxu1 %v166_v38  ;;  %v165_v40 = vpack.c.bf16 %v801_v39, %v799_v37 }
  0xe5   :  { %732 = vmatpush3.bf16.msra.mxu1 %v166_v38 }
  0xe6   :  { %733 = vmatprep.subr.bf16.mxu1 %v165_v40 }
  0xe9   :  { %734 = vmatpush3.bf16.msra.mxu1 %v165_v40 }
  0xec   :  { %736 = vmatmul.mubr.msk.bf16.vlgmr.msra.gmra.mxu1 %vm201_vm1, %v787_v41 }
 0x1ac   :  { %v737_v45 = vpop.f32.mrf.mxu1 }
 0x1ad   :  { %v251_v46 = vadd.f32 %v737_v45, %v184_v43  ;;  %v793_v45 = vld [vmem:[%s1101_s11 + $0x8] sm:$0xff]  }
 0x1ae   :  { %v242_v47 = vpop.f32.mrf.mxu1 }
 0x1af   :  { %802 = vtanh.f32 %v251_v46  ;;  %v243_v53 = vadd.f32 %v242_v47, %v174_v49  ;;  %v521_v46 = vpop.permute.xlu1 %520  ;;  %v526_v47 = vpop.permute.xlu0 %525 }
 0x1b0   :  { %v738_v48 = vpop.f32.mrf.mxu1 }
 0x1b1   :  { %v254_v50 = vadd.f32 %v738_v48, %v189_v44 }
 0x1b2   :  { %v245_v52 = vpop.f32.mrf.mxu1 }
 0x1b3   :  { %804 = vtanh.f32 %v254_v50  ;;  %v246_v54 = vadd.f32 %v245_v52, %v179_v51  ;;  %v511_v52 = vpop.permute.xlu1 %510 }
 0x1b5   :  { %806 = vtanh.f32 %v246_v54  ;;  %v516_v54 = vpop.permute.xlu0 %515 }
 0x1b6   :  { %808 = vtanh.f32 %v243_v53 }
 0x1bc   :  { %v803_v55 = vpop.eup %802 }
 0x1c0   :  { %v805_v56 = vpop.eup %804 }
 0x1c1   :  { %v263_v57 = vpack.c.bf16 %v805_v56, %v803_v55 }
 0x1c2   :  { %v807_v58 = vpop.eup %806 }
 0x1c3   :  { %740 = vmatpush3.bf16.msra.mxu0 %v263_v57  ;;  %v809_v59 = vpop.eup %808 }
 0x1c4   :  { %741 = vmatprep.subr.bf16.mxu0 %v873_v42  ;;  %v262_v60 = vpack.c.bf16 %v807_v58, %v809_v59 }
 0x1c7   :  { %742 = vmatpush3.bf16.msra.mxu0 %v262_v60 }
 0x1c8   :  { %753 = vmatprep.subr.bf16.mxu0 %v965_v0 }
 0x1ca   :  { %744 = vmatmul.mubr.msk.bf16.vlgmr.msra.gmra.mxu0 %vm201_vm1, %v261_v61 }
 0x1cb   :  { %754 = vmatpush3.bf16.msra.mxu0 %v965_v0  ;;  %755 = vmatprep.mubr.msk.bf16.mxu0 %vm101_vm0, %v788_v62  ;;  %v790_v0 = vld [vmem:[%s1099_s9] sm:$0xff]  }
 0x1cc   :  { %767 = vmatprep.subr.bf16.mxu0 %v873_v42  ;;  %749 = vmatprep.mubr.msk.bf16.mxu1 %vm341_vm3, %v790_v0  ;;  %v597_v0 = vld [vmem:[%s1103_s13] sm:$0x3] }
 0x1d2   :  { %756 = vmatmul.mubr.msk.bf16.vlgmr.msra.gmra.mxu0 %vm101_vm0, %v789_v63 }
 0x1d3   :  { %771 = vmatprep.mubr.msk.bf16.mxu0 %vm874_vm2, %v873_v42 }
 0x28a   :  { %v307_v2 = vpop.f32.mrf.mxu0 }
 0x28b   :  { %v308_v3 = vadd.f32 %v307_v2, %v268_v1 }
 0x28c   :  { %v745_v4 = vpop.f32.mrf.mxu0 }
 0x28d   :  { %v314_v5 = vmul.f32 0.5, %v308_v3  ;;  %650 = vst [vmem:[#allocation4] sm:$0xff] %v308_v3 }
 0x28e   :  { %v310_v6 = vpop.f32.mrf.mxu0 }
 0x28f   :  { %v315_v7 = vmul.f32 1.442695, %v314_v5 }
 0x290   :  { %v746_v8 = vpop.f32.mrf.mxu0 }
 0x291   :  { %810 = vpow2.f32 %v315_v7 }
 0x292   :  { %v757_v18 = vpop.f32.mrf.mxu0 }
 0x294   :  { %v451_v19 = vpop.f32.mrf.mxu0 }
 0x296   :  { %v758_v25 = vpop.f32.mrf.mxu0 }
 0x298   :  { %v454_v32 = vpop.f32.mrf.mxu0 }
 0x29e   :  { %v811_v9 = vpop.eup %810 }
 0x29f   :  { %v318_v11 = vrot.slane %v811_v9, 4 }
 0x2a1   :  { %v320_v12 = vmul.f32 %v318_v11, %v313_v10 }
 0x2a3   :  { %v321_v13 = vadd.f32 %v320_v12, %v308_v3 }
 0x2a5   :  { %v330_v14 = vpack.c.bf16 %v321_v13, %v321_v13 }
 0x2a7   :  { %775 = vmatprep.subr.msk.bf16.mxu1 %vm348_vm4, %v330_v14  ;;  %v350_v15 = vsel %vm348_vm4, %v330_v14, 0 }
 0x2a8   :  { %748 = vmatpush3.bf16.msra.mxu1 %v350_v15 }
 0x2ab   :  { %750 = vmatmul.mubr.msk.bf16.vlgmr.msra.gmra.mxu1 %vm341_vm3, %v791_v16 }
 0x2ac   :  { %763 = vmatprep.mubr.msk.bf16.mxu1 %vm201_vm1, %v792_v17 }
 0x36b   :  { %v751_v21 = vpop.f32.mrf.mxu1 }
 0x36c   :  { %v460_v23 = vadd.f32 %v757_v18, %v751_v21 }
 0x36d   :  { %v386_v24 = vpop.f32.mrf.mxu1 }
 0x36e   :  { %v452_v26 = vadd.f32 %v451_v19, %v386_v24  ;;  %v492_v27 = vadd.f32 %v483_v20, %v460_v23 }
 0x36f   :  { %v752_v28 = vpop.f32.mrf.mxu1 }
 0x370   :  { %v463_v30 = vadd.f32 %v758_v25, %v752_v28  ;;  %v490_v31 = vadd.f32 %v473_v29, %v452_v26  ;;  %812 = vtanh.f32 %v492_v27 }
 0x371   :  { %v389_v33 = vpop.f32.mrf.mxu1 }
 0x372   :  { %v493_v34 = vadd.f32 %v488_v22, %v463_v30  ;;  %v455_v35 = vadd.f32 %v454_v32, %v389_v33 }
 0x374   :  { %814 = vtanh.f32 %v493_v34  ;;  %v491_v37 = vadd.f32 %v478_v36, %v455_v35 }
 0x375   :  { %816 = vtanh.f32 %v490_v31 }
 0x376   :  { %818 = vtanh.f32 %v491_v37 }
 0x37d   :  { %v813_v38 = vpop.eup %812 }
 0x381   :  { %v815_v39 = vpop.eup %814 }
 0x382   :  { %v817_v40 = vpop.eup %816  ;;  %v503_v41 = vpack.c.bf16 %v815_v39, %v813_v38 }
 0x383   :  { %v819_v43 = vpop.eup %818 }
 0x384   :  { %759 = vmatprep.subr.bf16.mxu1 %v503_v41  ;;  %v502_v44 = vpack.c.bf16 %v819_v43, %v817_v40 }
 0x385   :  { %760 = vmatpush3.bf16.msra.mxu1 %v503_v41 }
 0x386   :  { %761 = vmatprep.subr.bf16.mxu1 %v502_v44 }
 0x389   :  { %762 = vmatpush3.bf16.msra.mxu1 %v502_v44 }
 0x38c   :  { %764 = vmatmul.mubr.msk.bf16.vlgmr.msra.gmra.mxu1 %vm201_vm1, %v793_v45 }
 0x44c   :  { %v765_v48 = vpop.f32.mrf.mxu1 }
 0x44d   :  { %v587_v49 = vadd.f32 %v765_v48, %v521_v46 }
 0x44e   :  { %v578_v50 = vpop.f32.mrf.mxu1 }
 0x44f   :  { %820 = vtanh.f32 %v587_v49  ;;  %v579_v56 = vadd.f32 %v578_v50, %v511_v52 }
 0x450   :  { %v766_v51 = vpop.f32.mrf.mxu1 }
 0x451   :  { %v590_v53 = vadd.f32 %v766_v51, %v526_v47 }
 0x452   :  { %v581_v55 = vpop.f32.mrf.mxu1 }
 0x453   :  { %822 = vtanh.f32 %v590_v53  ;;  %v582_v57 = vadd.f32 %v581_v55, %v516_v54 }
 0x455   :  { %824 = vtanh.f32 %v582_v57 }
 0x456   :  { %826 = vtanh.f32 %v579_v56 }
 0x45c   :  { %v821_v58 = vpop.eup %820 }
 0x460   :  { %v823_v59 = vpop.eup %822 }
 0x461   :  { %v599_v60 = vpack.c.bf16 %v823_v59, %v821_v58 }
 0x462   :  { %v825_v61 = vpop.eup %824 }
 0x463   :  { %768 = vmatpush3.bf16.msra.mxu0 %v599_v60  ;;  %v827_v62 = vpop.eup %826 }
 0x464   :  { %769 = vmatprep.subr.bf16.mxu0 %v873_v42  ;;  %v598_v63 = vpack.c.bf16 %v825_v61, %v827_v62 }
 0x467   :  { %770 = vmatpush3.bf16.msra.mxu0 %v598_v63 }
 0x46a   :  { %772 = vmatmul.mubr.msk.bf16.vlgmr.msra.gmra.mxu0 %vm201_vm1, %v597_v0 }
 0x46b   :  { %839 = shalt.err (!%p836_p4)
}
 0x46c   :  { %670 = dma.vmem_to_hbm [thread:$0]  %s668_s24, 128, %s1106_s16, [#allocation5]   ;;  %v604_v42 = vpop.permute.xlu1 %603 }
 0x46d   :  { %s876_s27 = smov [#allocation2]  }
 0x46e   :  { %s657_s3 = sshll.u32 %s876_s27, 4  ;;  %s658_s3 = int_to_ptr.vmem [resolvable:$true] %s657_s3 }
 0x46f   :  { %s848_s13 = scalar_lea.vmem %s658_s3, 64  ;;  %p853_p6 = scmp.lt.s32.totalorder %s658_s3, %s658_s3 }
 0x470   :  { %p849_p5 = scmp.ne.s32.totalorder %s658_s3, %s848_s13  ;;  %p854_p7 = scmp.lt.s32.totalorder %s848_s13, %s848_s13 }
 0x472   :  { %p855_p8 = por %p854_p7, %p853_p6 }
 0x474   :  { %p856_p9 = pnand %p855_p8, %p849_p5 }
 0x52a   :  { %v643_v1 = vpop.f32.mrf.mxu0 }
 0x52b   :  { %v644_v2 = vadd.f32 %v643_v1, %v604_v42 }
 0x52c   :  { %v773_v3 = vpop.f32.mrf.mxu0 }
 0x52d   :  { %649 = vst [vmem:[#allocation2] sm:$0xf] %v644_v2 }
 0x52e   :  { %v646_v4 = vpop.f32.mrf.mxu0 }
 0x52f   :  { %859 = shalt.err (!%p856_p9)
}
 0x530   :  { %660 = dma.vmem_to_hbm [thread:$0]  %s658_s3, 64, %s1105_s15, [#allocation3]   ;;  %v774_v5 = vpop.f32.mrf.mxu0 }
 0x531   :  { %868 = dma.done.wait [#allocation3], 64  }
 0x532   :  { %869 = vsyncadd [#allocation3], 4294967232 }
 0x533   :  { %870 = dma.done.wait [#allocation5], 128  }
 0x534   :  { %871 = vsyncadd [#allocation5], 4294967168 }
 0x535   :  { %677 = vsyncpa [#allocation3], 1 }
 0x536   :  { %678 = vsyncpa [#allocation5], 1 }

</bundles_post_ra>
